<compile_context>
chip_gen: v5e
topology: v5e:2x2
jax: 0.10.0
libtpu: 0.0.40
codegen_flags: <defaults>
</compile_context>

<pallas_src>
import functools

import jax
import jax.numpy as jnp
from jax import lax
from jax.experimental import pallas as pl
from jax.experimental.pallas import tpu as pltpu


# ----------------------------------------------------------------------------
# Small helpers (glue)
# ----------------------------------------------------------------------------
_LANE = 128


def _round_up(x, m):
    return ((x + m - 1) // m) * m


def _pick_tile(dim, max_tile):
    """Largest multiple of 128 that divides `dim` and is <= max_tile."""
    t = min(dim, max_tile)
    t -= t % _LANE
    t = max(t, _LANE)
    while dim % t:
        t -= _LANE
    return t


def _row_tile(n, max_tile):
    """Row tile; prefer >=2 tiles along the parallel axis (v7x has 2 TCs)."""
    cap = max_tile if n < 2 * _LANE else min(max_tile, n // 2)
    return _pick_tile(n, cap)


def _pad2d(x, rows, cols):
    r, c = x.shape
    if (r, c) == (rows, cols):
        return x
    return jnp.pad(x, ((0, rows - r), (0, cols - c)))


# ----------------------------------------------------------------------------
# Kernel 1: per-layer projections (hoisted out of the N^2 reduction)
#   self = x @ W_self + bias   (f32)
#   z    = x @ W_neigh         (compute dtype, fed to the aggregation kernel)
# ----------------------------------------------------------------------------
def _proj_kernel(x_ref, ws_ref, wn_ref, b_ref, self_ref, z_ref):
    x = x_ref[...]
    self_ref[...] = (jnp.dot(x, ws_ref[...], preferred_element_type=jnp.float32)
                     + b_ref[...])
    z_ref[...] = jnp.dot(x, wn_ref[...],
                         preferred_element_type=jnp.float32).astype(z_ref.dtype)


def sage_projection(x, w_self, w_neigh, bias, *, z_dtype, tm_max=512):
    n, f_in = x.shape
    f_out = w_self.shape[1]
    assert n % _LANE == 0 and f_in % _LANE == 0 and f_out % _LANE == 0
    tm = _row_tile(n, tm_max)

    cost = pl.CostEstimate(
        flops=int(4 * n * f_in * f_out),
        transcendentals=0,
        bytes_accessed=int(n * f_in * 4 + 2 * f_in * f_out * 4 + f_out * 4
                           + n * f_out * (4 + jnp.dtype(z_dtype).itemsize)),
    )
    return pl.pallas_call(
        _proj_kernel,
        out_shape=(jax.ShapeDtypeStruct((n, f_out), jnp.float32),
                   jax.ShapeDtypeStruct((n, f_out), z_dtype)),
        grid_spec=pltpu.PrefetchScalarGridSpec(
            num_scalar_prefetch=0,
            grid=(n // tm,),
            in_specs=[
                pl.BlockSpec((tm, f_in), lambda i: (i, 0)),      # x rows
                pl.BlockSpec((f_in, f_out), lambda i: (0, 0)),   # W_self
                pl.BlockSpec((f_in, f_out), lambda i: (0, 0)),   # W_neigh
                pl.BlockSpec((1, f_out), lambda i: (0, 0)),      # bias (f32)
            ],
            out_specs=[
                pl.BlockSpec((tm, f_out), lambda i: (i, 0)),     # self term
                pl.BlockSpec((tm, f_out), lambda i: (i, 0)),     # z
            ],
        ),
        compiler_params=pltpu.CompilerParams(
            dimension_semantics=("parallel",)),
        cost_estimate=cost,
    )(x, w_self, w_neigh, bias)


# ----------------------------------------------------------------------------
# Kernel 2: neighbor aggregation + epilogue
#   acc += adj01[i,k] @ z[k]       (single matmul per reduction step)
#   out  = acc * (1/deg) + self + bias  [+ relu]
# ----------------------------------------------------------------------------
def _agg_kernel(adj_ref, z_ref, self_ref, invdeg_ref, o_ref, acc_ref, *,
                apply_relu):
    k = pl.program_id(1)

    @pl.when(k == 0)
    def _():
        acc_ref[...] = jnp.zeros_like(acc_ref)

    acc_ref[...] += jnp.dot(adj_ref[...], z_ref[...],
                            preferred_element_type=jnp.float32)

    @pl.when(k == pl.num_programs(1) - 1)
    def _():
        out = acc_ref[...] * invdeg_ref[...] + self_ref[...]
        if apply_relu:
            out = jnp.maximum(out, 0.0)
        o_ref[...] = out.astype(o_ref.dtype)


def sage_aggregate(adj01, z, self_term, inv_deg, *, apply_relu,
                   tm_max=512, tk_max=1024):
    n = adj01.shape[0]
    f_out = z.shape[1]
    assert n % _LANE == 0 and f_out % _LANE == 0
    tm = _row_tile(n, tm_max)
    tk = _pick_tile(n, tk_max)
    grid = (n // tm, n // tk)

    adj_bytes = jnp.dtype(adj01.dtype).itemsize
    z_bytes = jnp.dtype(z.dtype).itemsize
    cost = pl.CostEstimate(
        flops=int(2 * n * n * f_out),
        transcendentals=0,
        bytes_accessed=int(n * n * adj_bytes
                           + n * f_out * (z_bytes + 4 + 4) + n * 4),
    )
    kernel = functools.partial(_agg_kernel, apply_relu=apply_relu)
    return pl.pallas_call(
        kernel,
        out_shape=jax.ShapeDtypeStruct((n, f_out), jnp.float32),
        grid_spec=pltpu.PrefetchScalarGridSpec(
            num_scalar_prefetch=0,
            grid=grid,
            in_specs=[
                pl.BlockSpec((tm, tk), lambda i, k: (i, k)),      # adj {0,1}
                pl.BlockSpec((tk, f_out), lambda i, k: (k, 0)),   # z = x @ W_n
                pl.BlockSpec((tm, f_out), lambda i, k: (i, 0)),   # x@W_s + b
                pl.BlockSpec((tm, 1), lambda i, k: (i, 0)),       # 1/deg (f32)
            ],
            out_specs=pl.BlockSpec((tm, f_out), lambda i, k: (i, 0)),
            scratch_shapes=[pltpu.VMEM((tm, f_out), jnp.float32)],
        ),
        compiler_params=pltpu.CompilerParams(
            dimension_semantics=("parallel", "arbitrary"),
            vmem_limit_bytes=48 * 1024 * 1024,   # > default, < v7x physical
        ),
        cost_estimate=cost,
    )(adj01, z, self_term, inv_deg)


# ----------------------------------------------------------------------------
# Kernel 3: blocked edge scoring  sigmoid( sum(h[src] * h[dst], -1) )
#   TE edges per grid step; src/dst scalar-prefetched (SMEM), h resident in
#   VMEM, in-kernel dynamic row gather, lane-dense (1,1,TE) output store.
# ----------------------------------------------------------------------------
def _edge_score_kernel(src_ref, dst_ref, h_ref, o_ref, hs_ref, hd_ref, *,
                       te, use_sigmoid):
    base = pl.program_id(0) * te

    def gather(e, carry):
        s = src_ref[base + e]
        d = dst_ref[base + e]
        hs_ref[pl.ds(e, 1), :] = h_ref[pl.ds(s, 1), :]
        hd_ref[pl.ds(e, 1), :] = h_ref[pl.ds(d, 1), :]
        return carry

    lax.fori_loop(0, te, gather, 0)

    prod = hs_ref[...].astype(jnp.float32) * hd_ref[...].astype(jnp.float32)
    s = jnp.sum(prod, axis=-1)                       # (te,)
    if use_sigmoid:
        s = jax.nn.sigmoid(s)
    o_ref[...] = s.reshape(1, 1, te)                 # lane-dense store


def edge_scores(h, src, dst, *, use_sigmoid=True):
    # TODO(synk): for graphs where h does not fit in VMEM, switch the h block
    # to memory_space=pl.ANY and replace the in-VMEM row gather with a manual
    # double-buffered DMA gather.
    n, f = h.shape
    e = int(src.shape[0])
    te = 256 if e >= 256 else _round_up(max(e, 1), _LANE)
    e_pad = _round_up(e, te)
    num_blocks = e_pad // te
    src_p = jnp.pad(src.astype(jnp.int32), (0, e_pad - e))   # pad with node 0
    dst_p = jnp.pad(dst.astype(jnp.int32), (0, e_pad - e))

    kernel = functools.partial(_edge_score_kernel, te=te,
                               use_sigmoid=use_sigmoid)
    cost = pl.CostEstimate(
        flops=int(2 * e_pad * f),
        transcendentals=int(e_pad if use_sigmoid else 0),
        bytes_accessed=int(n * f * h.dtype.itemsize
                           + 2 * e_pad * 4 + e_pad * 4),
    )
    out = pl.pallas_call(
        kernel,
        out_shape=jax.ShapeDtypeStruct((num_blocks, 1, te), jnp.float32),
        grid_spec=pltpu.PrefetchScalarGridSpec(
            num_scalar_prefetch=2,                     # src, dst -> SMEM
            grid=(num_blocks,),
            in_specs=[
                # Whole (padded) h: constant block index => stays in VMEM.
                pl.BlockSpec((n, f), lambda i, s, d: (0, 0)),
            ],
            out_specs=pl.BlockSpec((1, 1, te), lambda i, s, d: (i, 0, 0)),
            scratch_shapes=[pltpu.VMEM((te, f), h.dtype),
                            pltpu.VMEM((te, f), h.dtype)],
        ),
        compiler_params=pltpu.CompilerParams(
            dimension_semantics=("parallel",)),
        cost_estimate=cost,
    )(src_p, dst_p, h)
    return out.reshape(e_pad)[:e]                      # [E]


# ----------------------------------------------------------------------------
# Model wrapper (parameter handling + padding glue)
# ----------------------------------------------------------------------------
def init_sage_params(key, in_size, hid_size, out_size, num_layers=2):
    if num_layers == 1:
        sizes = [(in_size, out_size)]
    else:
        sizes = [(in_size, hid_size)]
        sizes += [(hid_size, hid_size)] * (num_layers - 2)
        sizes += [(hid_size, out_size)]
    params = []
    for (fi, fo) in sizes:
        key, k1, k2 = jax.random.split(key, 3)
        scale = 1.0 / jnp.sqrt(jnp.float32(fi))
        w_self = jax.random.uniform(k1, (fi, fo), jnp.float32, -scale, scale)
        w_neigh = jax.random.uniform(k2, (fi, fo), jnp.float32, -scale, scale)
        bias = jnp.zeros((1, fo), jnp.float32)
        params.append((w_self, w_neigh, bias))
    return params


def sage_forward(params, feat, adj01, src, dst, *, use_sigmoid=True,
                 compute_dtype=jnp.float32):
    """adj01[i, j] in {0,1}: edge j -> i.  Mean aggregation via 1/deg epilogue."""
    # TODO(synk): dense {0,1} adjacency matmul; a CSR-blocked, DMA-gathered
    # aggregation is needed to scale to sparse real graphs.
    n = feat.shape[0]
    n_pad = _round_up(n, _LANE)

    deg = jnp.sum(adj01.astype(jnp.float32), axis=1, keepdims=True)   # (n,1)
    inv_deg = 1.0 / jnp.maximum(deg, 1.0)
    inv_deg = _pad2d(inv_deg, n_pad, 1)                               # f32
    # {0,1} is exact in any float dtype; bf16 halves the N^2 HBM stream.
    adj_p = _pad2d(adj01.astype(jnp.float32), n_pad, n_pad).astype(compute_dtype)

    h = feat.astype(jnp.float32)
    num_layers = len(params)
    for i, (w_self, w_neigh, bias) in enumerate(params):
        f_in, f_out = w_self.shape
        fpi, fpo = _round_up(f_in, _LANE), _round_up(f_out, _LANE)
        h = _pad2d(h, n_pad, fpi)
        ws = _pad2d(w_self, fpi, fpo)
        wn = _pad2d(w_neigh, fpi, fpo)
        b = _pad2d(bias, 1, fpo)
        # TODO(synk): feat_drop / self.dropout are identity in eval mode;
        # training-mode stochastic dropout is intentionally not implemented.
        self_term, z = sage_projection(h, ws, wn, b, z_dtype=compute_dtype)
        h = sage_aggregate(adj_p, z, self_term, inv_deg,
                           apply_relu=(i != num_layers - 1))

    # Padded feature columns of h are exactly zero, so scoring over padded h
    # equals scoring over the unpadded h.
    return edge_scores(h, src, dst, use_sigmoid=use_sigmoid)


# ----------------------------------------------------------------------------
# Pure-JAX reference for a sanity check
# ----------------------------------------------------------------------------
def sage_forward_ref(params, feat, adj01, src, dst, use_sigmoid=True):
    deg = jnp.sum(adj01, axis=1, keepdims=True)
    adj_norm = adj01 / jnp.maximum(deg, 1.0)
    h = feat
    num_layers = len(params)
    for i, (w_self, w_neigh, bias) in enumerate(params):
        neigh = adj_norm @ h
        h = h @ w_self + neigh @ w_neigh + bias
        if i != num_layers - 1:
            h = jnp.maximum(h, 0.0)
    s = jnp.sum(h[src] * h[dst], axis=-1)
    return jax.nn.sigmoid(s) if use_sigmoid else s


if __name__ == "__main__":
    key = jax.random.PRNGKey(0)
    N, IN, HID, OUT, E = 512, 48, 64, 16, 128

    k_feat, k_adj, k_src, k_dst, k_params = jax.random.split(key, 5)

    # Node features [N, IN]
    feat = jax.random.normal(k_feat, (N, IN), jnp.float32)

    # Random directed graph; adj[i, j] = 1 means edge j -> i (message src -> dst).
    adj01 = (jax.random.uniform(k_adj, (N, N)) < 0.05).astype(jnp.float32)
    adj01 = adj01 * (1.0 - jnp.eye(N, dtype=jnp.float32))     # no self loops

    # Candidate link endpoints
    src = jax.random.randint(k_src, (E,), 0, N, dtype=jnp.int32)
    dst = jax.random.randint(k_dst, (E,), 0, N, dtype=jnp.int32)

    params = init_sage_params(k_params, IN, HID, OUT, num_layers=2)

    ref = sage_forward_ref(params, feat, adj01, src, dst, use_sigmoid=True)

    # f32 path (tight check).
    scores = jax.block_until_ready(
        sage_forward(params, feat, adj01, src, dst,
                     use_sigmoid=True, compute_dtype=jnp.float32))
    assert scores.shape == (E,)
    assert jnp.allclose(scores, ref, atol=1e-4, rtol=1e-4), \
        float(jnp.max(jnp.abs(scores - ref)))

    # bf16 path (looser check): {0,1} adjacency exact in bf16, f32 1/deg + self
    # epilogue, so only z and the MXU multiply are rounded.
    scores_bf16 = jax.block_until_ready(
        sage_forward(params, feat, adj01, src, dst,
                     use_sigmoid=True, compute_dtype=jnp.bfloat16))
    assert jnp.allclose(scores_bf16, ref, atol=5e-2), \
        float(jnp.max(jnp.abs(scores_bf16 - ref)))

    print("KERNEL_OK")
</pallas_src>

<mosaic_0001>
module attributes {stable_mosaic.version = 11 : i64} {
  func.func @_proj_kernel(%arg0: i32, %arg1: memref<256x128xf32, #tpu.memory_space<vmem>>, %arg2: memref<128x128xf32, #tpu.memory_space<vmem>>, %arg3: memref<128x128xf32, #tpu.memory_space<vmem>>, %arg4: memref<1x128xf32, #tpu.memory_space<vmem>>, %arg5: memref<256x128xf32, #tpu.memory_space<vmem>>, %arg6: memref<256x128xf32, #tpu.memory_space<vmem>>) attributes {dimension_semantics = [#tpu.dimension_semantics<parallel>], iteration_bounds = array<i64: 2>, scalar_prefetch = 0 : i64, scratch_operands = 0 : i64, tpu.core_type = #tpu.core_type<tc>, window_params = [{transform_indices = @transform_0, window_bounds = array<i64: 256, 128>}, {pipeline_mode = #tpu.pipeline_mode<synchronous>, transform_indices = @transform_1, window_bounds = array<i64: 128, 128>}, {pipeline_mode = #tpu.pipeline_mode<synchronous>, transform_indices = @transform_2, window_bounds = array<i64: 128, 128>}, {pipeline_mode = #tpu.pipeline_mode<synchronous>, transform_indices = @transform_3, window_bounds = array<i64: 1, 128>}, {transform_indices = @transform_4, window_bounds = array<i64: 256, 128>}, {transform_indices = @transform_5, window_bounds = array<i64: 256, 128>}]} {
    %c0 = arith.constant 0 : index
    %c0_0 = arith.constant 0 : index
    %0 = vector.load %arg1[%c0, %c0_0] : memref<256x128xf32, #tpu.memory_space<vmem>>, vector<256x128xf32>
    %c0_1 = arith.constant 0 : index
    %c0_2 = arith.constant 0 : index
    %1 = vector.load %arg2[%c0_1, %c0_2] : memref<128x128xf32, #tpu.memory_space<vmem>>, vector<128x128xf32>
    %cst = arith.constant dense<0.000000e+00> : vector<256x128xf32>
    %2 = tpu.matmul %0, %1, %cst {dimension_numbers = #tpu.dot_dimension_numbers<[1], [0], [0], [1], [0, 0, 1, 1], [], []>} : vector<256x128xf32>, vector<128x128xf32>, vector<256x128xf32> -> vector<256x128xf32>
    %c0_3 = arith.constant 0 : index
    %c0_4 = arith.constant 0 : index
    %3 = vector.load %arg4[%c0_3, %c0_4] : memref<1x128xf32, #tpu.memory_space<vmem>>, vector<1x128xf32>
    %4 = vector.broadcast %3 : vector<1x128xf32> to vector<256x128xf32>
    %5 = arith.addf %2, %4 : vector<256x128xf32>
    %c0_5 = arith.constant 0 : index
    %c0_6 = arith.constant 0 : index
    %6 = vector.load %arg5[%c0_5, %c0_6] : memref<256x128xf32, #tpu.memory_space<vmem>>, vector<256x128xf32>
    tpu.vector_store %arg5[%c0_5, %c0_6], %5 {strides = array<i32>} : memref<256x128xf32, #tpu.memory_space<vmem>>, vector<256x128xf32>,
    %c0_7 = arith.constant 0 : index
    %c0_8 = arith.constant 0 : index
    %7 = vector.load %arg3[%c0_7, %c0_8] : memref<128x128xf32, #tpu.memory_space<vmem>>, vector<128x128xf32>
    %cst_9 = arith.constant dense<0.000000e+00> : vector<256x128xf32>
    %8 = tpu.matmul %0, %7, %cst_9 {dimension_numbers = #tpu.dot_dimension_numbers<[1], [0], [0], [1], [0, 0, 1, 1], [], []>} : vector<256x128xf32>, vector<128x128xf32>, vector<256x128xf32> -> vector<256x128xf32>
    %c0_10 = arith.constant 0 : index
    %c0_11 = arith.constant 0 : index
    %9 = vector.load %arg6[%c0_10, %c0_11] : memref<256x128xf32, #tpu.memory_space<vmem>>, vector<256x128xf32>
    tpu.vector_store %arg6[%c0_10, %c0_11], %8 {strides = array<i32>} : memref<256x128xf32, #tpu.memory_space<vmem>>, vector<256x128xf32>,
    return
  }
  func.func @transform_0(%arg0: i32) -> (i32, i32) {
    %c0_i32 = arith.constant 0 : i32
    %c0_i32_0 = arith.constant 0 : i32
    return %arg0, %c0_i32 : i32, i32
  }
  func.func @transform_1(%arg0: i32) -> (i32, i32) {
    %c0_i32 = arith.constant 0 : i32
    %c0_i32_0 = arith.constant 0 : i32
    %c0_i32_1 = arith.constant 0 : i32
    return %c0_i32, %c0_i32_0 : i32, i32
  }
  func.func @transform_2(%arg0: i32) -> (i32, i32) {
    %c0_i32 = arith.constant 0 : i32
    %c0_i32_0 = arith.constant 0 : i32
    %c0_i32_1 = arith.constant 0 : i32
    return %c0_i32, %c0_i32_0 : i32, i32
  }
  func.func @transform_3(%arg0: i32) -> (i32, i32) {
    %c0_i32 = arith.constant 0 : i32
    %c0_i32_0 = arith.constant 0 : i32
    %c0_i32_1 = arith.constant 0 : i32
    return %c0_i32, %c0_i32_0 : i32, i32
  }
  func.func @transform_4(%arg0: i32) -> (i32, i32) {
    %c0_i32 = arith.constant 0 : i32
    %c0_i32_0 = arith.constant 0 : i32
    return %arg0, %c0_i32 : i32, i32
  }
  func.func @transform_5(%arg0: i32) -> (i32, i32) {
    %c0_i32 = arith.constant 0 : i32
    %c0_i32_0 = arith.constant 0 : i32
    return %arg0, %c0_i32 : i32, i32
  }
}

</mosaic_0001>

<bundles_post_ra>
// kernel: tpu_custom_call.1
= control target key start
LH: loop header
LB: loop body
LE: loop exit
PB: predicated region body
PF: predicated region fallthrough
CT: control target
= control target key end

     0   :  { %11 = vsyncpa [#allocation3], 0  ;;  %s1494_s0 = inlined_call_operand.hbm [shape: f32[512,128], index: 0, kind: input, shape index: {}]   ;;  %s1495_s1 = inlined_call_operand.hbm [shape: f32[128,128], index: 1, kind: input, shape index: {}]   ;;  %s1496_s2 = inlined_call_operand.hbm [shape: f32[128,128], index: 2, kind: input, shape index: {}]   ;;  %s1497_s3 = inlined_call_operand.vmem [shape: f32[1,128], index: 3, kind: input, shape index: {}]   ;;  %s1498_s4 = inlined_call_operand.hbm [shape: f32[512,128], index: 4, kind: output, shape index: {0}]   ;;  %s1499_s5 = inlined_call_operand.hbm [shape: f32[512,128], index: 5, kind: output, shape index: {1}]  }
   0x1   :  { %13 = vsyncpa [#allocation3 + $0x1], 0 }
   0x2   :  { %14 = vsyncpa [#allocation6], 0 }
   0x3   :  { %15 = vsyncpa [#allocation4], 0 }
   0x4   :  { %17 = vsyncpa [#allocation4 + $0x1], 0 }
   0x5   :  { %18 = vsyncpa [#allocation10], 0 }
   0x6   :  { %20 = vsyncpa [#allocation10 + $0x1], 0  ;;  %s1177_s18 = smov 0   ;;  %s1179_s19 = smov 0  }
   0x7   :  { %s1181_s20 = smov 0   ;;  %s1183_s21 = smov 0  }
   0x8 LB: > { %s1198_s22 = sadd.s32 4294967295, %s1139_s21   ;;  %s813_s23 = sadd.s32 4294967294, %s1139_s21   ;;  %s1139_s21 = sphi %s1183_s21, %s1511_s21   ;;  %s1135_s20 = sphi %s1181_s20, %s1510_s20   ;;  %s1131_s19 = sphi %s1179_s19, %s1509_s19   ;;  %s1127_s18 = sphi %s1177_s18, %s1508_s18  }
   0x9   : > { %p46_p0 = scmp.ne.s32.totalorder %s1131_s19, %s1127_s18  ;;  %p47_p1 = scmp.eq.s32.totalorder %s1198_s22, 0 }
   0xa   : > { %p133_p2 = scmp.eq.s32.totalorder %s1198_s22, 1  ;;  %p139_p3 = scmp.eq.s32.totalorder %s813_s23, 1 }
   0xb   : > { %p1207_p4 = por %p47_p1, %p46_p0  ;;  %p814_p5 = scmp.ge.s32.totalorder %s1139_s21, 1 }
   0xc   : > { %p1212_p6 = por %p139_p3, %p46_p0  ;;  %p172_p7 = scmp.lt.s32.totalorder %s1139_s21, 3 }
   0xd   : > { %s183_s28 = sshll.u32 %s1495_s1, 4  ;;  %s1141_s30 = smov [#allocation5]   ;;  %s184_s28 = int_to_ptr.hbm [resolvable:$true] %s183_s28 }
   0xe   : > { %p1220_p8 = pnand %p814_p5, %p172_p7  ;;  %s185_s6 = sshll.u32 %s1141_s30, 4  ;;  %s186_s6 = int_to_ptr.vmem [resolvable:$true] %s185_s6 }
   0xf   : > { %s197_s9 = sshll.u32 %s1496_s2, 4  ;;  %s1500_s10 = smov 128   ;;  %s198_s9 = int_to_ptr.hbm [resolvable:$true] %s197_s9 }
  0x10   : > { %p884_p9 = pneg %p1220_p8  ;;  %s1143_s11 = smov 8  }
  0x11   : > { %s1144_s12 = smov [#allocation7]   ;;  %s1239_s14 = sadd.s32 1, %s1139_s21  }
  0x12   : > { %p885_p10 = pnand %p884_p9, %p47_p1  ;;  %s199_s13 = sshll.u32 %s1144_s12, 4  ;;  %s200_s13 = int_to_ptr.vmem [resolvable:$true] %s199_s13 }
  0x13   : > { %s33_s15 = sadd.s32 1, %s1135_s20  ;;  %s30_s16 = ssub.s32 %s1139_s21, %s1239_s14 }
  0x14   : > { %887 = dma.hbm_to_vmem [thread:$0]  (!%p885_p10), %s184_s28, 2048, %s186_s6, [#allocation6], %s1500_s10, %s1500_s10, %s1143_s11  }
  0x15   : > { %890 = dma.hbm_to_vmem [thread:$0]  (!%p885_p10), %s198_s9, 2048, %s200_s13, [#allocation6], %s1500_s10, %s1500_s10, %s1143_s11  }
  0x16   : > { %p40_p12 = scmp.ne.s32.totalorder %s1135_s20, %s1131_s19  ;;  %p31_p13 = scmp.eq.s32.totalorder %s30_s16, 0 }
  0x17   : > { %p41_p0 = scmp.eq.s32.totalorder %s1139_s21, 0  ;;  %p904_p5 = scmp.lt.s32.totalorder %s1139_s21, 2 }
  0x18   : > { %p1249_p3 = por %p133_p2, %p40_p12  ;;  %s216_s26 = sand.u32 1, %s1135_s20  }
  0x19   : > { %s1255_s23 = scalar_select %p31_p13, %s1135_s20, %s33_s15  }
  0x1a   : > { %p42_p7 = por %p41_p0, %p40_p12  ;;  %s818_s27 = sshll.u32 %s216_s26, 8 }
  0x1b   : > { %s835_s28 = sshll.u32 %s1139_s21, 8  ;;  %s220_s8 = scalar_lea.vmem [#allocation2], %s818_s27 }
  0x1c   : > { %s225_s7 = scalar_lea.hbm %s1494_s0, %s835_s28  ;;  %s228_s9 = sshll.u32 %s220_s8, 4  ;;  %s229_s9 = int_to_ptr.vmem [resolvable:$true] %s228_s9 }
  0x1d   : > { %s226_s12 = sshll.u32 %s225_s7, 4  ;;  %p1262_p2 = pnand %p904_p5, %p42_p7  ;;  %s227_s12 = int_to_ptr.hbm [resolvable:$true] %s226_s12 }
  0x1e   : > { %s217_s15 = scalar_lea.sflag [#allocation3], %s216_s26  ;;  %s1007_s16 = sshra.s32 %s227_s12, 4  ;;  %s1008_s16 = int_to_ptr.hbm [resolvable:$true] %s1007_s16 }
  0x1f   : > { %s1009_s10 = scalar_lea.hbm %s1008_s16, 256  ;;  %p1011_p10 = pneg %p1262_p2 }
  0x20   : > { %p1010_p9 = scmp.ne.s32.totalorder %s1008_s16, %s1009_s10  ;;  %s1014_s30 = scalar_lea.hbm %s1494_s0, 512 }
  0x21   : > { %p1015_p0 = scmp.lt.s32.totalorder %s1008_s16, %s1494_s0  ;;  %p1016_p5 = scmp.lt.s32.totalorder %s1014_s30, %s1009_s10 }
  0x22   : > { %p1012_p12 = pnand %p1011_p10, %p1010_p9 }
  0x23   : > { %p1017_p7 = por %p1016_p5, %p1015_p0 }
  0x24   : > { %p1013_p13 = pneg %p1012_p12 }
  0x26   : > { %p1018_p11 = pnand %p1017_p7, %p1013_p13 }
  0x28   : > { %1021 = shalt.err (!%p1018_p11)
}
  0x29   : > { %s1506_s26 = smov 128   ;;  %240 = sbr.rel (%p1220_p8) target bundleno = 350 (0x15e), region = 36 }
  0x2a   : > { %894 = dma.hbm_to_vmem [thread:$0]  (!%p1262_p2), %s227_s12, 4096, %s229_s9, %s217_s15, %s1506_s26, %s1506_s26, %s1143_s11  }
  0x2b   : > { %s1282_s8 = sand.u32 (!%p1220_p8), 1, %s1131_s19  }
  0x2c   : > { %s1285_s16 = sshll.u32 (!%p1220_p8), %s1282_s8, 8  ;;  %s243_s10 = scalar_lea.sflag (!%p1220_p8), [#allocation3], %s1282_s8 }
  0x2d   : > { %s1289_s28 = scalar_lea.vmem (!%p1220_p8), [#allocation2], %s1285_s16 }
  0x2e   : > { %1110 = dma.done.wait (%p1207_p4), %s243_s10, 4096  }
  0x2f   : > { %1112 = vsyncadd (%p1207_p4), %s243_s10, 4294963200 }
  0x30   : > { %1114 = dma.done.wait (%p47_p1), [#allocation6], 4096  }
  0x31   : > { %1116 = vsyncadd (%p47_p1), [#allocation6], 4294963200  ;;  %v339_v0 = vld [vmem:[#allocation5 + $0x78] sm:$0xff]  ;;  %v338_v1 = vld [vmem:[#allocation5 + $0x70] sm:$0xff]  ;;  %s1338_s11 = scalar_lea.vmem [#allocation9], %s1285_s16  ;;  %s1342_s9 = scalar_lea.vmem [#allocation8], %s1285_s16 }
  0x32   : > { %v504_v2 = vld [vmem:[#allocation7 + $0x78] sm:$0xff]  ;;  %838 = vmatpush.msra.mxu2 %v339_v0  ;;  %v503_v3 = vld [vmem:[#allocation7 + $0x70] sm:$0xff]  ;;  %v337_v4 = vld [vmem:[#allocation5 + $0x68] sm:$0xff]  ;;  %344 = vmatpush.msra.mxu0 %v339_v0  ;;  %s836_s12 = sshll.u32 %s1198_s22, 8  ;;  %s668_s26 = sshll.u32 %s1342_s9, 4  ;;  %s1446_s26 = int_to_ptr.vmem [resolvable:$true] %s668_s26 }
  0x33   : > { %854 = vmatpush.msra.mxu3 %v504_v2  ;;  %v502_v5 = vld [vmem:[#allocation7 + $0x68] sm:$0xff]  ;;  %505 = vmatpush.msra.mxu1 %v504_v2  ;;  %v336_v6 = vld [vmem:[#allocation5 + $0x60] sm:$0xff]  ;;  %v335_v8 = vld [vmem:[#allocation5 + $0x58] sm:$0xff]  ;;  %s684_s27 = scalar_lea.hbm %s1499_s5, %s836_s12  ;;  %s667_s7 = scalar_lea.hbm %s1498_s4, %s836_s12 }
  0x34   : > { %839 = vmatpush.msra.mxu2 %v338_v1  ;;  %345 = vmatpush.msra.mxu0 %v338_v1  ;;  %v501_v7 = vld [vmem:[#allocation7 + $0x60] sm:$0xff]  ;;  %v500_v9 = vld [vmem:[#allocation7 + $0x58] sm:$0xff]  ;;  %v334_v10 = vld [vmem:[#allocation5 + $0x50] sm:$0xff]  ;;  %s685_s22 = sshll.u32 %s1338_s11, 4  ;;  %s687_s16 = sshll.u32 %s684_s27, 4  ;;  %s686_s22 = int_to_ptr.vmem [resolvable:$true] %s685_s22  ;;  %s688_s16 = int_to_ptr.hbm [resolvable:$true] %s687_s16 }
  0x35   : > { %855 = vmatpush.msra.mxu3 %v503_v3  ;;  %506 = vmatpush.msra.mxu1 %v503_v3  ;;  %v499_v11 = vld [vmem:[#allocation7 + $0x50] sm:$0xff]  ;;  %v333_v12 = vld [vmem:[#allocation5 + $0x48] sm:$0xff]  ;;  %v332_v14 = vld [vmem:[#allocation5 + $0x40] sm:$0xff]  ;;  %s670_s10 = sshll.u32 %s667_s7, 4  ;;  %s1051_s24 = sshra.s32 %s688_s16, 4  ;;  %s1448_s10 = int_to_ptr.hbm [resolvable:$true] %s670_s10  ;;  %s1052_s24 = int_to_ptr.hbm [resolvable:$true] %s1051_s24 }
  0x36   : > { %840 = vmatpush.msra.mxu2 %v337_v4  ;;  %346 = vmatpush.msra.mxu0 %v337_v4  ;;  %v498_v13 = vld [vmem:[#allocation7 + $0x48] sm:$0xff]  ;;  %v497_v15 = vld [vmem:[#allocation7 + $0x40] sm:$0xff]  ;;  %v331_v16 = vld [vmem:[#allocation5 + $0x38] sm:$0xff]  ;;  %s1053_s29 = scalar_lea.hbm %s1052_s24, 256  ;;  %s1057_s15 = scalar_lea.hbm %s1499_s5, 512 }
  0x37   : > { %856 = vmatpush.msra.mxu3 %v502_v5  ;;  %507 = vmatpush.msra.mxu1 %v502_v5  ;;  %v496_v17 = vld [vmem:[#allocation7 + $0x38] sm:$0xff]  ;;  %v330_v18 = vld [vmem:[#allocation5 + $0x30] sm:$0xff]  ;;  %v329_v20 = vld [vmem:[#allocation5 + $0x28] sm:$0xff]  ;;  %p1054_p1 = scmp.ne.s32.totalorder %s1052_s24, %s1053_s29  ;;  %p1058_p11 = scmp.lt.s32.totalorder %s1052_s24, %s1499_s5 }
  0x38   : > { %841 = vmatpush.msra.mxu2 %v336_v6  ;;  %347 = vmatpush.msra.mxu0 %v336_v6  ;;  %v495_v19 = vld [vmem:[#allocation7 + $0x30] sm:$0xff]  ;;  %v494_v21 = vld [vmem:[#allocation7 + $0x28] sm:$0xff]  ;;  %v328_v22 = vld [vmem:[#allocation5 + $0x20] sm:$0xff]  ;;  %p1059_p2 = scmp.lt.s32.totalorder %s1057_s15, %s1053_s29 }
  0x39   : > { %857 = vmatpush.msra.mxu3 %v501_v7  ;;  %508 = vmatpush.msra.mxu1 %v501_v7  ;;  %v493_v23 = vld [vmem:[#allocation7 + $0x20] sm:$0xff]  ;;  %v327_v24 = vld [vmem:[#allocation5 + $0x18] sm:$0xff]  ;;  %v326_v26 = vld [vmem:[#allocation5 + $0x10] sm:$0xff]  ;;  %p1055_p4 = pnand %p1054_p1, %p1249_p3 }
  0x3a   : > { %842 = vmatpush.msra.mxu2 %v335_v8  ;;  %348 = vmatpush.msra.mxu0 %v335_v8  ;;  %v492_v25 = vld [vmem:[#allocation7 + $0x18] sm:$0xff]  ;;  %v491_v27 = vld [vmem:[#allocation7 + $0x10] sm:$0xff]  ;;  %v325_v28 = vld [vmem:[#allocation5 + $0x8] sm:$0xff]  ;;  %p1060_p9 = por %p1059_p2, %p1058_p11 }
  0x3b   : > { %858 = vmatpush.msra.mxu3 %v500_v9  ;;  %509 = vmatpush.msra.mxu1 %v500_v9  ;;  %v490_v29 = vld [vmem:[#allocation7 + $0x8] sm:$0xff]  ;;  %v324_v30 = vld [vmem:[#allocation5] sm:$0xff]  ;;  %v310_v36 = vld [vmem:[%s1289_s28 + $0x90] sm:$0xff]  ;;  %p1056_p8 = pneg %p1055_p4 }
  0x3c   : > { %843 = vmatpush.msra.mxu2 %v334_v10  ;;  %349 = vmatpush.msra.mxu0 %v334_v10  ;;  %v489_v31 = vld [vmem:[#allocation7] sm:$0xff]  ;;  %v309_v34 = vld [vmem:[%s1289_s28 + $0x88] sm:$0xff]  ;;  %v294_v37 = vld [vmem:[%s1289_s28 + $0x10] sm:$0xff] }
  0x3d   : > { %859 = vmatpush.msra.mxu3 %v499_v11  ;;  %510 = vmatpush.msra.mxu1 %v499_v11  ;;  %v308_v32 = vld [vmem:[%s1289_s28 + $0x80] sm:$0xff]  ;;  %v293_v35 = vld [vmem:[%s1289_s28 + $0x8] sm:$0xff]  ;;  %v311_v38 = vld [vmem:[%s1289_s28 + $0x98] sm:$0xff]  ;;  %p1061_p10 = pnand %p1060_p9, %p1056_p8 }
  0x3e   : > { %844 = vmatpush.msra.mxu2 %v333_v12  ;;  %350 = vmatpush.msra.mxu0 %v333_v12  ;;  %v292_v33 = vld [vmem:[%s1289_s28] sm:$0xff]  ;;  %v295_v39 = vld [vmem:[%s1289_s28 + $0x18] sm:$0xff]  ;;  %v313_v42 = vld [vmem:[%s1289_s28 + $0xa8] sm:$0xff] }
  0x3f   : > { %860 = vmatpush.msra.mxu3 %v498_v13  ;;  %511 = vmatpush.msra.mxu1 %v498_v13  ;;  %v312_v40 = vld [vmem:[%s1289_s28 + $0xa0] sm:$0xff]  ;;  %v297_v43 = vld [vmem:[%s1289_s28 + $0x28] sm:$0xff]  ;;  %v314_v44 = vld [vmem:[%s1289_s28 + $0xb0] sm:$0xff] }
  0x40   : > { %845 = vmatpush.msra.mxu2 %v332_v14  ;;  %351 = vmatpush.msra.mxu0 %v332_v14  ;;  %v296_v41 = vld [vmem:[%s1289_s28 + $0x20] sm:$0xff]  ;;  %v298_v45 = vld [vmem:[%s1289_s28 + $0x30] sm:$0xff]  ;;  %v315_v46 = vld [vmem:[%s1289_s28 + $0xb8] sm:$0xff] }
  0x41   : > { %861 = vmatpush.msra.mxu3 %v497_v15  ;;  %512 = vmatpush.msra.mxu1 %v497_v15  ;;  %v299_v47 = vld [vmem:[%s1289_s28 + $0x38] sm:$0xff]  ;;  %v316_v48 = vld [vmem:[%s1289_s28 + $0xc0] sm:$0xff]  ;;  %v317_v50 = vld [vmem:[%s1289_s28 + $0xc8] sm:$0xff] }
  0x42   : > { %846 = vmatpush.msra.mxu2 %v331_v16  ;;  %352 = vmatpush.msra.mxu0 %v331_v16  ;;  %v300_v49 = vld [vmem:[%s1289_s28 + $0x40] sm:$0xff]  ;;  %v301_v51 = vld [vmem:[%s1289_s28 + $0x48] sm:$0xff]  ;;  %v318_v52 = vld [vmem:[%s1289_s28 + $0xd0] sm:$0xff] }
  0x43   : > { %862 = vmatpush.msra.mxu3 %v496_v17  ;;  %513 = vmatpush.msra.mxu1 %v496_v17  ;;  %v302_v53 = vld [vmem:[%s1289_s28 + $0x50] sm:$0xff]  ;;  %v319_v54 = vld [vmem:[%s1289_s28 + $0xd8] sm:$0xff]  ;;  %v320_v56 = vld [vmem:[%s1289_s28 + $0xe0] sm:$0xff] }
  0x44   : > { %847 = vmatpush.msra.mxu2 %v330_v18  ;;  %353 = vmatpush.msra.mxu0 %v330_v18  ;;  %v303_v55 = vld [vmem:[%s1289_s28 + $0x58] sm:$0xff]  ;;  %v304_v57 = vld [vmem:[%s1289_s28 + $0x60] sm:$0xff]  ;;  %v321_v58 = vld [vmem:[%s1289_s28 + $0xe8] sm:$0xff] }
  0x45   : > { %863 = vmatpush.msra.mxu3 %v495_v19  ;;  %514 = vmatpush.msra.mxu1 %v495_v19  ;;  %v305_v59 = vld [vmem:[%s1289_s28 + $0x68] sm:$0xff]  ;;  %v322_v60 = vld [vmem:[%s1289_s28 + $0xf0] sm:$0xff]  ;;  %v323_v62 = vld [vmem:[%s1289_s28 + $0xf8] sm:$0xff] }
  0x46   : > { %848 = vmatpush.msra.mxu2 %v329_v20  ;;  %354 = vmatpush.msra.mxu0 %v329_v20  ;;  %v306_v61 = vld [vmem:[%s1289_s28 + $0x70] sm:$0xff]  ;;  %v307_v63 = vld [vmem:[%s1289_s28 + $0x78] sm:$0xff]  ;;  %v1334_v0 = vld [vmem:[%s1497_s3] ss:$0 sm:$0xff]  ;;  %s656_s28 = scalar_lea.sflag [#allocation10], %s1282_s8 }
  0x47   : > { %864 = vmatpush.msra.mxu3 %v494_v21  ;;  %515 = vmatpush.msra.mxu1 %v494_v21 }
  0x48   : > { %849 = vmatpush.msra.mxu2 %v328_v22  ;;  %355 = vmatpush.msra.mxu0 %v328_v22 }
  0x49   : > { %865 = vmatpush.msra.mxu3 %v493_v23  ;;  %516 = vmatpush.msra.mxu1 %v493_v23 }
  0x4a   : > { %850 = vmatpush.msra.mxu2 %v327_v24  ;;  %356 = vmatpush.msra.mxu0 %v327_v24 }
  0x4b   : > { %866 = vmatpush.msra.mxu3 %v492_v25  ;;  %517 = vmatpush.msra.mxu1 %v492_v25 }
  0x4c   : > { %851 = vmatpush.msra.mxu2 %v326_v26  ;;  %357 = vmatpush.msra.mxu0 %v326_v26 }
  0x4d   : > { %867 = vmatpush.msra.mxu3 %v491_v27  ;;  %518 = vmatpush.msra.mxu1 %v491_v27 }
  0x4e   : > { %852 = vmatpush.msra.mxu2 %v325_v28  ;;  %358 = vmatpush.msra.mxu0 %v325_v28 }
  0x4f   : > { %868 = vmatpush.msra.mxu3 %v490_v29  ;;  %519 = vmatpush.msra.mxu1 %v490_v29 }
  0x50   : > { %853 = vmatpush.msra.mxu2 %v324_v30  ;;  %359 = vmatpush.msra.mxu0 %v324_v30 }
  0x51   : > { %869 = vmatpush.msra.mxu3 %v489_v31  ;;  %408 = vmatmul.f32.vlgmr.msra.gmra.mxu2 %v308_v32 }
  0x52   : > { %569 = vmatmul.f32.vlgmr.msra.gmra.mxu3 %v308_v32  ;;  %520 = vmatpush.msra.mxu1 %v489_v31 }
  0x53   : > { %360 = vmatmul.f32.vlgmr.msra.gmra.mxu0 %v292_v33  ;;  %521 = vmatmul.f32.vlgmr.msra.gmra.mxu1 %v292_v33 }
  0x59   : > { %411 = vmatmul.f32.gmra.mxu2 %v309_v34 }
  0x5a   : > { %572 = vmatmul.f32.gmra.mxu3 %v309_v34 }
  0x5b   : > { %363 = vmatmul.f32.gmra.mxu0 %v293_v35  ;;  %524 = vmatmul.f32.gmra.mxu1 %v293_v35 }
  0x61   : > { %414 = vmatmul.f32.gmra.mxu2 %v310_v36 }
  0x62   : > { %575 = vmatmul.f32.gmra.mxu3 %v310_v36 }
  0x63   : > { %366 = vmatmul.f32.gmra.mxu0 %v294_v37  ;;  %527 = vmatmul.f32.gmra.mxu1 %v294_v37 }
  0x69   : > { %417 = vmatmul.f32.gmra.mxu2 %v311_v38 }
  0x6a   : > { %578 = vmatmul.f32.gmra.mxu3 %v311_v38 }
  0x6b   : > { %369 = vmatmul.f32.gmra.mxu0 %v295_v39  ;;  %530 = vmatmul.f32.gmra.mxu1 %v295_v39 }
  0x71   : > { %420 = vmatmul.f32.gmra.mxu2 %v312_v40 }
  0x72   : > { %581 = vmatmul.f32.gmra.mxu3 %v312_v40 }
  0x73   : > { %372 = vmatmul.f32.gmra.mxu0 %v296_v41  ;;  %533 = vmatmul.f32.gmra.mxu1 %v296_v41 }
  0x79   : > { %423 = vmatmul.f32.gmra.mxu2 %v313_v42 }
  0x7a   : > { %584 = vmatmul.f32.gmra.mxu3 %v313_v42 }
  0x7b   : > { %375 = vmatmul.f32.gmra.mxu0 %v297_v43  ;;  %536 = vmatmul.f32.gmra.mxu1 %v297_v43 }
  0x81   : > { %426 = vmatmul.f32.gmra.mxu2 %v314_v44 }
  0x82   : > { %587 = vmatmul.f32.gmra.mxu3 %v314_v44 }
  0x83   : > { %378 = vmatmul.f32.gmra.mxu0 %v298_v45  ;;  %539 = vmatmul.f32.gmra.mxu1 %v298_v45 }
  0x89   : > { %429 = vmatmul.f32.gmra.mxu2 %v315_v46 }
  0x8a   : > { %590 = vmatmul.f32.gmra.mxu3 %v315_v46 }
  0x8b   : > { %381 = vmatmul.f32.gmra.mxu0 %v299_v47  ;;  %542 = vmatmul.f32.gmra.mxu1 %v299_v47 }
  0x91   : > { %432 = vmatmul.f32.gmra.mxu2 %v316_v48 }
  0x92   : > { %593 = vmatmul.f32.gmra.mxu3 %v316_v48 }
  0x93   : > { %384 = vmatmul.f32.gmra.mxu0 %v300_v49  ;;  %545 = vmatmul.f32.gmra.mxu1 %v300_v49 }
  0x99   : > { %435 = vmatmul.f32.gmra.mxu2 %v317_v50 }
  0x9a   : > { %596 = vmatmul.f32.gmra.mxu3 %v317_v50 }
  0x9b   : > { %387 = vmatmul.f32.gmra.mxu0 %v301_v51  ;;  %548 = vmatmul.f32.gmra.mxu1 %v301_v51 }
  0xa1   : > { %438 = vmatmul.f32.gmra.mxu2 %v318_v52 }
  0xa2   : > { %599 = vmatmul.f32.gmra.mxu3 %v318_v52 }
  0xa3   : > { %390 = vmatmul.f32.gmra.mxu0 %v302_v53  ;;  %551 = vmatmul.f32.gmra.mxu1 %v302_v53 }
  0xa9   : > { %441 = vmatmul.f32.gmra.mxu2 %v319_v54 }
  0xaa   : > { %602 = vmatmul.f32.gmra.mxu3 %v319_v54 }
  0xab   : > { %393 = vmatmul.f32.gmra.mxu0 %v303_v55  ;;  %554 = vmatmul.f32.gmra.mxu1 %v303_v55 }
  0xb1   : > { %444 = vmatmul.f32.gmra.mxu2 %v320_v56 }
  0xb2   : > { %605 = vmatmul.f32.gmra.mxu3 %v320_v56 }
  0xb3   : > { %396 = vmatmul.f32.gmra.mxu0 %v304_v57  ;;  %557 = vmatmul.f32.gmra.mxu1 %v304_v57 }
  0xb9   : > { %447 = vmatmul.f32.gmra.mxu2 %v321_v58 }
  0xba   : > { %608 = vmatmul.f32.gmra.mxu3 %v321_v58 }
  0xbb   : > { %399 = vmatmul.f32.gmra.mxu0 %v305_v59  ;;  %560 = vmatmul.f32.gmra.mxu1 %v305_v59 }
  0xc1   : > { %450 = vmatmul.f32.gmra.mxu2 %v322_v60 }
  0xc2   : > { %611 = vmatmul.f32.gmra.mxu3 %v322_v60 }
  0xc3   : > { %402 = vmatmul.f32.gmra.mxu0 %v306_v61  ;;  %563 = vmatmul.f32.gmra.mxu1 %v306_v61 }
  0xc9   : > { %453 = vmatmul.f32.gmra.mxu2 %v323_v62 }
  0xca   : > { %614 = vmatmul.f32.gmra.mxu3 %v323_v62 }
  0xcb   : > { %405 = vmatmul.f32.gmra.mxu0 %v307_v63  ;;  %566 = vmatmul.f32.gmra.mxu1 %v307_v63 }
  0xd0   : > { %v361_v1 = vpop.f32.mrf.mxu0  ;;  %v522_v2 = vpop.f32.mrf.mxu1 }
  0xd1   : > { %v362_v3 = vadd.f32 %v1334_v0, %v361_v1  ;;  %618 = vst [vmem:[%s1338_s11] sm:$0xff] %v522_v2 }
  0xd3   : > { %457 = vst [vmem:[%s1342_s9] sm:$0xff] %v362_v3 }
  0xd4   : > { %v409_v4 = vpop.f32.mrf.mxu2 }
  0xd5   : > { %v570_v5 = vpop.f32.mrf.mxu3  ;;  %v410_v6 = vadd.f32 %v1334_v0, %v409_v4 }
  0xd6   : > { %634 = vst [vmem:[%s1338_s11 + $0x80] sm:$0xff] %v570_v5 }
  0xd7   : > { %473 = vst [vmem:[%s1342_s9 + $0x80] sm:$0xff] %v410_v6 }
  0xd8   : > { %v364_v7 = vpop.f32.mrf.mxu0  ;;  %v525_v8 = vpop.f32.mrf.mxu1 }
  0xd9   : > { %v365_v9 = vadd.f32 %v1334_v0, %v364_v7  ;;  %619 = vst [vmem:[%s1338_s11 + $0x8] sm:$0xff] %v525_v8 }
  0xdb   : > { %458 = vst [vmem:[%s1342_s9 + $0x8] sm:$0xff] %v365_v9 }
  0xdc   : > { %v412_v10 = vpop.f32.mrf.mxu2 }
  0xdd   : > { %v573_v11 = vpop.f32.mrf.mxu3  ;;  %v413_v12 = vadd.f32 %v1334_v0, %v412_v10 }
  0xde   : > { %635 = vst [vmem:[%s1338_s11 + $0x88] sm:$0xff] %v573_v11 }
  0xdf   : > { %474 = vst [vmem:[%s1342_s9 + $0x88] sm:$0xff] %v413_v12 }
  0xe0   : > { %v367_v13 = vpop.f32.mrf.mxu0  ;;  %v528_v14 = vpop.f32.mrf.mxu1 }
  0xe1   : > { %v368_v15 = vadd.f32 %v1334_v0, %v367_v13  ;;  %620 = vst [vmem:[%s1338_s11 + $0x10] sm:$0xff] %v528_v14 }
  0xe3   : > { %459 = vst [vmem:[%s1342_s9 + $0x10] sm:$0xff] %v368_v15 }
  0xe4   : > { %v415_v16 = vpop.f32.mrf.mxu2 }
  0xe5   : > { %v576_v17 = vpop.f32.mrf.mxu3  ;;  %v416_v18 = vadd.f32 %v1334_v0, %v415_v16 }
  0xe6   : > { %636 = vst [vmem:[%s1338_s11 + $0x90] sm:$0xff] %v576_v17 }
  0xe7   : > { %475 = vst [vmem:[%s1342_s9 + $0x90] sm:$0xff] %v416_v18 }
  0xe8   : > { %v370_v19 = vpop.f32.mrf.mxu0  ;;  %v531_v20 = vpop.f32.mrf.mxu1 }
  0xe9   : > { %v371_v21 = vadd.f32 %v1334_v0, %v370_v19  ;;  %621 = vst [vmem:[%s1338_s11 + $0x18] sm:$0xff] %v531_v20 }
  0xeb   : > { %460 = vst [vmem:[%s1342_s9 + $0x18] sm:$0xff] %v371_v21 }
  0xec   : > { %v418_v22 = vpop.f32.mrf.mxu2 }
  0xed   : > { %v579_v23 = vpop.f32.mrf.mxu3  ;;  %v419_v24 = vadd.f32 %v1334_v0, %v418_v22 }
  0xee   : > { %637 = vst [vmem:[%s1338_s11 + $0x98] sm:$0xff] %v579_v23 }
  0xef   : > { %476 = vst [vmem:[%s1342_s9 + $0x98] sm:$0xff] %v419_v24 }
  0xf0   : > { %v373_v25 = vpop.f32.mrf.mxu0  ;;  %v534_v26 = vpop.f32.mrf.mxu1 }
  0xf1   : > { %v374_v27 = vadd.f32 %v1334_v0, %v373_v25  ;;  %622 = vst [vmem:[%s1338_s11 + $0x20] sm:$0xff] %v534_v26 }
  0xf3   : > { %461 = vst [vmem:[%s1342_s9 + $0x20] sm:$0xff] %v374_v27 }
  0xf4   : > { %v421_v28 = vpop.f32.mrf.mxu2 }
  0xf5   : > { %v582_v29 = vpop.f32.mrf.mxu3  ;;  %v422_v30 = vadd.f32 %v1334_v0, %v421_v28 }
  0xf6   : > { %638 = vst [vmem:[%s1338_s11 + $0xa0] sm:$0xff] %v582_v29 }
  0xf7   : > { %477 = vst [vmem:[%s1342_s9 + $0xa0] sm:$0xff] %v422_v30 }
  0xf8   : > { %v376_v31 = vpop.f32.mrf.mxu0  ;;  %v537_v32 = vpop.f32.mrf.mxu1 }
  0xf9   : > { %v377_v33 = vadd.f32 %v1334_v0, %v376_v31  ;;  %623 = vst [vmem:[%s1338_s11 + $0x28] sm:$0xff] %v537_v32 }
  0xfb   : > { %462 = vst [vmem:[%s1342_s9 + $0x28] sm:$0xff] %v377_v33 }
  0xfc   : > { %v424_v34 = vpop.f32.mrf.mxu2 }
  0xfd   : > { %v585_v35 = vpop.f32.mrf.mxu3  ;;  %v425_v36 = vadd.f32 %v1334_v0, %v424_v34 }
  0xfe   : > { %639 = vst [vmem:[%s1338_s11 + $0xa8] sm:$0xff] %v585_v35 }
  0xff   : > { %478 = vst [vmem:[%s1342_s9 + $0xa8] sm:$0xff] %v425_v36 }
 0x100   : > { %v379_v37 = vpop.f32.mrf.mxu0  ;;  %v540_v38 = vpop.f32.mrf.mxu1 }
 0x101   : > { %v380_v39 = vadd.f32 %v1334_v0, %v379_v37  ;;  %624 = vst [vmem:[%s1338_s11 + $0x30] sm:$0xff] %v540_v38 }
 0x103   : > { %463 = vst [vmem:[%s1342_s9 + $0x30] sm:$0xff] %v380_v39 }
 0x104   : > { %v427_v40 = vpop.f32.mrf.mxu2 }
 0x105   : > { %v588_v41 = vpop.f32.mrf.mxu3  ;;  %v428_v42 = vadd.f32 %v1334_v0, %v427_v40 }
 0x106   : > { %640 = vst [vmem:[%s1338_s11 + $0xb0] sm:$0xff] %v588_v41 }
 0x107   : > { %479 = vst [vmem:[%s1342_s9 + $0xb0] sm:$0xff] %v428_v42 }
 0x108   : > { %v382_v43 = vpop.f32.mrf.mxu0  ;;  %v543_v44 = vpop.f32.mrf.mxu1 }
 0x109   : > { %v383_v45 = vadd.f32 %v1334_v0, %v382_v43  ;;  %625 = vst [vmem:[%s1338_s11 + $0x38] sm:$0xff] %v543_v44 }
 0x10b   : > { %464 = vst [vmem:[%s1342_s9 + $0x38] sm:$0xff] %v383_v45 }
 0x10c   : > { %v430_v46 = vpop.f32.mrf.mxu2 }
 0x10d   : > { %v591_v47 = vpop.f32.mrf.mxu3  ;;  %v431_v48 = vadd.f32 %v1334_v0, %v430_v46 }
 0x10e   : > { %641 = vst [vmem:[%s1338_s11 + $0xb8] sm:$0xff] %v591_v47 }
 0x10f   : > { %480 = vst [vmem:[%s1342_s9 + $0xb8] sm:$0xff] %v431_v48 }
 0x110   : > { %v385_v49 = vpop.f32.mrf.mxu0  ;;  %v546_v50 = vpop.f32.mrf.mxu1 }
 0x111   : > { %v386_v51 = vadd.f32 %v1334_v0, %v385_v49  ;;  %626 = vst [vmem:[%s1338_s11 + $0x40] sm:$0xff] %v546_v50 }
 0x113   : > { %465 = vst [vmem:[%s1342_s9 + $0x40] sm:$0xff] %v386_v51 }
 0x114   : > { %v433_v52 = vpop.f32.mrf.mxu2 }
 0x115   : > { %v594_v53 = vpop.f32.mrf.mxu3  ;;  %v434_v54 = vadd.f32 %v1334_v0, %v433_v52 }
 0x116   : > { %642 = vst [vmem:[%s1338_s11 + $0xc0] sm:$0xff] %v594_v53 }
 0x117   : > { %481 = vst [vmem:[%s1342_s9 + $0xc0] sm:$0xff] %v434_v54 }
 0x118   : > { %v388_v55 = vpop.f32.mrf.mxu0  ;;  %v549_v56 = vpop.f32.mrf.mxu1 }
 0x119   : > { %v389_v57 = vadd.f32 %v1334_v0, %v388_v55  ;;  %627 = vst [vmem:[%s1338_s11 + $0x48] sm:$0xff] %v549_v56 }
 0x11b   : > { %466 = vst [vmem:[%s1342_s9 + $0x48] sm:$0xff] %v389_v57 }
 0x11c   : > { %v436_v58 = vpop.f32.mrf.mxu2 }
 0x11d   : > { %v597_v59 = vpop.f32.mrf.mxu3  ;;  %v437_v60 = vadd.f32 %v1334_v0, %v436_v58 }
 0x11e   : > { %643 = vst [vmem:[%s1338_s11 + $0xc8] sm:$0xff] %v597_v59 }
 0x11f   : > { %482 = vst [vmem:[%s1342_s9 + $0xc8] sm:$0xff] %v437_v60 }
 0x120   : > { %v391_v61 = vpop.f32.mrf.mxu0  ;;  %v552_v62 = vpop.f32.mrf.mxu1 }
 0x121   : > { %v392_v63 = vadd.f32 %v1334_v0, %v391_v61  ;;  %628 = vst [vmem:[%s1338_s11 + $0x50] sm:$0xff] %v552_v62 }
 0x123   : > { %467 = vst [vmem:[%s1342_s9 + $0x50] sm:$0xff] %v392_v63 }
 0x124   : > { %v439_v1 = vpop.f32.mrf.mxu2 }
 0x125   : > { %v600_v2 = vpop.f32.mrf.mxu3  ;;  %v440_v3 = vadd.f32 %v1334_v0, %v439_v1 }
 0x126   : > { %644 = vst [vmem:[%s1338_s11 + $0xd0] sm:$0xff] %v600_v2 }
 0x127   : > { %483 = vst [vmem:[%s1342_s9 + $0xd0] sm:$0xff] %v440_v3 }
 0x128   : > { %v394_v4 = vpop.f32.mrf.mxu0  ;;  %v555_v5 = vpop.f32.mrf.mxu1 }
 0x129   : > { %v395_v6 = vadd.f32 %v1334_v0, %v394_v4  ;;  %629 = vst [vmem:[%s1338_s11 + $0x58] sm:$0xff] %v555_v5 }
 0x12b   : > { %468 = vst [vmem:[%s1342_s9 + $0x58] sm:$0xff] %v395_v6 }
 0x12c   : > { %v442_v7 = vpop.f32.mrf.mxu2 }
 0x12d   : > { %v603_v8 = vpop.f32.mrf.mxu3  ;;  %v443_v9 = vadd.f32 %v1334_v0, %v442_v7 }
 0x12e   : > { %645 = vst [vmem:[%s1338_s11 + $0xd8] sm:$0xff] %v603_v8 }
 0x12f   : > { %484 = vst [vmem:[%s1342_s9 + $0xd8] sm:$0xff] %v443_v9 }
 0x130   : > { %v397_v10 = vpop.f32.mrf.mxu0  ;;  %v558_v11 = vpop.f32.mrf.mxu1 }
 0x131   : > { %v398_v12 = vadd.f32 %v1334_v0, %v397_v10  ;;  %630 = vst [vmem:[%s1338_s11 + $0x60] sm:$0xff] %v558_v11 }
 0x133   : > { %469 = vst [vmem:[%s1342_s9 + $0x60] sm:$0xff] %v398_v12 }
 0x134   : > { %v445_v13 = vpop.f32.mrf.mxu2 }
 0x135   : > { %v606_v14 = vpop.f32.mrf.mxu3  ;;  %v446_v15 = vadd.f32 %v1334_v0, %v445_v13 }
 0x136   : > { %646 = vst [vmem:[%s1338_s11 + $0xe0] sm:$0xff] %v606_v14 }
 0x137   : > { %485 = vst [vmem:[%s1342_s9 + $0xe0] sm:$0xff] %v446_v15 }
 0x138   : > { %v400_v16 = vpop.f32.mrf.mxu0  ;;  %v561_v17 = vpop.f32.mrf.mxu1 }
 0x139   : > { %v401_v18 = vadd.f32 %v1334_v0, %v400_v16  ;;  %631 = vst [vmem:[%s1338_s11 + $0x68] sm:$0xff] %v561_v17 }
 0x13b   : > { %470 = vst [vmem:[%s1342_s9 + $0x68] sm:$0xff] %v401_v18 }
 0x13c   : > { %v448_v19 = vpop.f32.mrf.mxu2 }
 0x13d   : > { %v609_v20 = vpop.f32.mrf.mxu3  ;;  %v449_v21 = vadd.f32 %v1334_v0, %v448_v19 }
 0x13e   : > { %647 = vst [vmem:[%s1338_s11 + $0xe8] sm:$0xff] %v609_v20 }
 0x13f   : > { %486 = vst [vmem:[%s1342_s9 + $0xe8] sm:$0xff] %v449_v21 }
 0x140   : > { %v403_v22 = vpop.f32.mrf.mxu0  ;;  %v564_v23 = vpop.f32.mrf.mxu1 }
 0x141   : > { %v404_v24 = vadd.f32 %v1334_v0, %v403_v22  ;;  %632 = vst [vmem:[%s1338_s11 + $0x70] sm:$0xff] %v564_v23 }
 0x143   : > { %471 = vst [vmem:[%s1342_s9 + $0x70] sm:$0xff] %v404_v24 }
 0x144   : > { %v451_v25 = vpop.f32.mrf.mxu2 }
 0x145   : > { %v612_v26 = vpop.f32.mrf.mxu3  ;;  %v452_v27 = vadd.f32 %v1334_v0, %v451_v25 }
 0x146   : > { %648 = vst [vmem:[%s1338_s11 + $0xf0] sm:$0xff] %v612_v26 }
 0x147   : > { %487 = vst [vmem:[%s1342_s9 + $0xf0] sm:$0xff] %v452_v27 }
 0x148   : > { %v406_v28 = vpop.f32.mrf.mxu0  ;;  %v567_v29 = vpop.f32.mrf.mxu1 }
 0x149   : > { %v407_v30 = vadd.f32 %v1334_v0, %v406_v28  ;;  %633 = vst [vmem:[%s1338_s11 + $0x78] sm:$0xff] %v567_v29 }
 0x14b   : > { %472 = vst [vmem:[%s1342_s9 + $0x78] sm:$0xff] %v407_v30 }
 0x14c   : > { %v454_v31 = vpop.f32.mrf.mxu2 }
 0x14d   : > { %v615_v32 = vpop.f32.mrf.mxu3  ;;  %v455_v33 = vadd.f32 %v1334_v0, %v454_v31 }
 0x14e   : > { %649 = vst [vmem:[%s1338_s11 + $0xf8] sm:$0xff] %v615_v32 }
 0x14f   : > { %1064 = shalt.err (!%p1061_p10)
}
 0x150   : > { %s1145_s11 = smov 128   ;;  %s1146_s6 = smov 8   ;;  %488 = vst [vmem:[%s1342_s9 + $0xf8] sm:$0xff] %v455_v33 }
 0x151   : > { %881 = dma.vmem_to_hbm [thread:$0]  (%p1249_p3), %s686_s22, 4096, %s688_s16, %s656_s28, %s1145_s11, %s1145_s11, %s1146_s6  }
 0x152   : > { %s651_s7 = scalar_lea.sflag [#allocation4], %s1282_s8  ;;  %s1079_s12 = sshra.s32 %s1448_s10, 4  ;;  %s1080_s12 = int_to_ptr.hbm [resolvable:$true] %s1079_s12 }
 0x153   : > { %s1081_s13 = scalar_lea.hbm %s1080_s12, 256  ;;  %s1085_s15 = scalar_lea.hbm %s1498_s4, 512 }
 0x154   : > { %p1082_p12 = scmp.ne.s32.totalorder %s1080_s12, %s1081_s13  ;;  %p1086_p5 = scmp.lt.s32.totalorder %s1080_s12, %s1498_s4 }
 0x155   : > { %p1087_p7 = scmp.lt.s32.totalorder %s1085_s15, %s1081_s13 }
 0x156   : > { %p1083_p13 = pnand %p1082_p12, %p1249_p3 }
 0x157   : > { %p1088_p1 = por %p1087_p7, %p1086_p5 }
 0x158   : > { %p1084_p0 = pneg %p1083_p13 }
 0x15a   : > { %p1089_p4 = pnand %p1088_p1, %p1084_p0 }
 0x15c   : > { %1092 = shalt.err (!%p1089_p4)
}
 0x15d   : > { %880 = dma.vmem_to_hbm [thread:$0]  (%p1249_p3), %s1446_s26, 4096, %s1448_s10, %s651_s7, %s1145_s11, %s1145_s11, %s1146_s6  }
 0x15e PF: > { %s702_s8 = sand.u32 1, %s1127_s18   ;;  %p1507_p8 = scmp.ge.s32.totalorder %s1139_s21, 2 }
 0x15f   : > { %s703_s9 = scalar_lea.sflag [#allocation4], %s702_s8 }
 0x160   : > { %p896_p11 = pnand %p1507_p8, %p1212_p6 }
 0x162   : > { %p897_p2 = pneg %p896_p11 }
 0x164   : > { %1118 = dma.done.wait (%p897_p2), %s703_s9, 4096  }
 0x165   : > { %1120 = vsyncadd (%p897_p2), %s703_s9, 4294963200  ;;  %s713_s22 = scalar_lea.sflag [#allocation10], %s702_s8 }
 0x166   : > { %1122 = dma.done.wait (%p897_p2), %s713_s22, 4096  }
 0x167   : > { %1124 = vsyncadd (%p897_p2), %s713_s22, 4294963200  ;;  %p23_p3 = scmp.ge.s32.totalorder %s1239_s14, 4   ;;  %s1508_s18 = smov %s1131_s19 }
 0x168   : > { %s1509_s19 = smov %s1135_s20  ;;  %s1510_s20 = smov %s1255_s23 }
 0x169   : > { %s1511_s21 = smov %s1239_s14  ;;  %25 = sbr.rel (!%p23_p3) target bundleno = 8 (0x8), region = 106 }
 0x16e   :  { %719 = vsyncpa [#allocation3], 1 }
 0x16f   :  { %721 = vsyncpa [#allocation3 + $0x1], 1 }
 0x170   :  { %722 = vsyncpa [#allocation6], 1 }
 0x171   :  { %723 = vsyncpa [#allocation4], 1 }
 0x172   :  { %725 = vsyncpa [#allocation4 + $0x1], 1 }
 0x173   :  { %726 = vsyncpa [#allocation10], 1 }
 0x174   :  { %728 = vsyncpa [#allocation10 + $0x1], 1 }

</bundles_post_ra>
